<compile_context>
chip_gen: v7x
topology: tpu7x:2x2x1
jax: 0.10.0
libtpu: 0.0.40
codegen_flags: <defaults>
</compile_context>

<pallas_src>
import functools

import jax
import jax.numpy as jnp
from jax import lax
from jax.experimental import pallas as pl
from jax.experimental.pallas import tpu as pltpu

_LANE = 128


def _finetune_kernel(x_ref, wb_ref, wbeta_ref, out_ref, acc_ref, *, inv_spatial):
    # x_ref:     (tn, ts, Cin) bf16  input feature tile (channels on the lane axis)
    # wb_ref:    (Cin, Cp)     bf16  synthetic backbone 1x1-conv weight (C padded to 128)
    # wbeta_ref: (Cp, Cp)      f32   pre-classifier (beta) weight, zero-padded
    # out_ref:   (tn, Cp)      f32   L2-normalized embeddings (padded lanes stay 0)
    # acc_ref:   (tn, Cp)      f32   running spatial sum of relu(x @ wb)
    s_idx = pl.program_id(1)

    @pl.when(s_idx == 0)
    def _():
        acc_ref[...] = jnp.zeros_like(acc_ref)

    tn, ts, cin = x_ref.shape
    # One large (tn*ts, Cin) x (Cin, Cp) MXU matmul instead of tn batched matmuls.
    x2d = x_ref[...].reshape(tn * ts, cin)
    feat = jnp.dot(x2d, wb_ref[...], preferred_element_type=jnp.float32)
    feat = jnp.maximum(feat, 0.0)  # ReLU, f32 on the VPU

    # Accumulate the per-batch-row spatial sum (mean finalized below).
    acc_ref[...] += feat.reshape(tn, ts, -1).sum(axis=1)

    @pl.when(s_idx == pl.num_programs(1) - 1)
    def _():
        # adaptive_avg_pool2d(x, 1): mean over spatial.  The beta (C->C) matmul is
        # hoisted after pooling: mean_s(relu(x@Wb) @ Wbeta) == mean_s(relu(x@Wb)) @ Wbeta.
        pooled = acc_ref[...] * inv_spatial                      # (tn, Cp) f32
        emb = jnp.dot(pooled, wbeta_ref[...], preferred_element_type=jnp.float32)
        # F.normalize(x, dim=1): clamp moved onto ||x||^2 (1e-24 == (1e-12)^2) so the
        # divide becomes an EUP rsqrt + a VPU multiply.
        sumsq = jnp.sum(emb * emb, axis=1, keepdims=True)
        out_ref[...] = (emb * lax.rsqrt(jnp.maximum(sumsq, 1e-24))).astype(out_ref.dtype)


def _pick_spatial_tile(s, max_tile):
    for cand in (max_tile, 512, 256, 128, 64, 32, 16, 8):
        if cand <= max_tile and cand % 8 == 0 and cand <= s and s % cand == 0:
            return cand
    return s  # fall back to the full spatial extent


def finetune_forward(x_nchw, w_backbone, w_beta, *, max_spatial_tile=512):
    """Pallas forward for FinetuneModel (NCC head + use_beta).

    x_nchw:     (N, Cin, H, W) float32
    w_backbone: (Cin, C)  synthetic-backbone 1x1-conv weight
    w_beta:     (C, C)    pre-classifier (beta) transform weight
    returns:    (N, C)    L2-normalized pooled embeddings
    """
    n, cin, h, w = x_nchw.shape
    c = w_backbone.shape[1]
    s = h * w

    # NCHW -> (N, S=H*W, Cin) with channels on the lane axis; cast to bf16 so the
    # MXU gets bf16 operands and HBM->VMEM traffic for x is halved (accumulation
    # inside the kernel stays f32).
    # TODO(synk): request NHWC (or fuse this transpose into the input DMA) so it
    # does not materialize an extra HBM copy of the activations.
    x_nsc = jnp.transpose(x_nchw, (0, 2, 3, 1)).reshape(n, s, cin).astype(jnp.bfloat16)

    # Pad the output-channel dim to a full 128-lane register so the pooled
    # accumulator and the final store are lane-dense (unmasked vst).  Padded lanes
    # carry exact zeros through relu/pool/beta and do not perturb the L2 norm.
    cp = ((c + _LANE - 1) // _LANE) * _LANE
    wb_p = jnp.zeros((cin, cp), jnp.bfloat16).at[:, :c].set(w_backbone.astype(jnp.bfloat16))
    wbeta_p = jnp.zeros((cp, cp), jnp.float32).at[:c, :c].set(w_beta.astype(jnp.float32))

    # Tile sizes: 8-row batch tiles when possible (sublane aligned), spatial tile
    # capped at max_spatial_tile.  All tiles are tiny relative to VMEM, and the
    # limit is set explicitly (safe for v7x's 64 MiB physical / 32 MiB scoped VMEM).
    tn = 8 if n % 8 == 0 else n
    ts = _pick_spatial_tile(s, max_spatial_tile)
    grid = (n // tn, s // ts)

    kernel = functools.partial(_finetune_kernel, inv_spatial=1.0 / float(s))

    out_padded = pl.pallas_call(
        kernel,
        out_shape=jax.ShapeDtypeStruct((n, cp), jnp.float32),
        grid_spec=pltpu.PrefetchScalarGridSpec(
            num_scalar_prefetch=0,
            grid=grid,
            in_specs=[
                pl.BlockSpec((tn, ts, cin), lambda i, k: (i, k, 0)),  # x tile
                pl.BlockSpec((cin, cp), lambda i, k: (0, 0)),          # backbone weight
                pl.BlockSpec((cp, cp), lambda i, k: (0, 0)),           # beta weight
            ],
            out_specs=pl.BlockSpec((tn, cp), lambda i, k: (i, 0)),
            scratch_shapes=[pltpu.VMEM((tn, cp), jnp.float32)],
        ),
        compiler_params=pltpu.CompilerParams(
            # batch tiles are independent (megacore-parallel on v7x); the spatial
            # axis is the pooling reduction -> arbitrary, innermost.
            dimension_semantics=("parallel", "arbitrary"),
            vmem_limit_bytes=32 * 1024 * 1024,
        ),
    )(x_nsc, wb_p, wbeta_p)

    return out_padded[:, :c]


if __name__ == "__main__":
    # Small shapes consistent with the module: batch=2, in-channels=4,
    # spatial=16x16, backbone feature dim C=32.
    N, CIN, H, W = 2, 4, 16, 16
    C = 32

    key = jax.random.PRNGKey(0)
    kx, kb, kbeta = jax.random.split(key, 3)
    x = jax.random.normal(kx, (N, CIN, H, W), dtype=jnp.float32)
    w_backbone = jax.random.normal(kb, (CIN, C), dtype=jnp.float32) * 0.1
    w_beta = jax.random.normal(kbeta, (C, C), dtype=jnp.float32) * 0.1

    # max_spatial_tile=128 exercises the multi-step pooled-accumulation path
    # (grid = (1, 2)) even at these toy shapes.
    out = finetune_forward(x, w_backbone, w_beta, max_spatial_tile=128)
    out = jax.block_until_ready(out)

    # Pure-JAX reference (original op order, f32 end-to-end).
    x_nsc = jnp.transpose(x, (0, 2, 3, 1)).reshape(N, H * W, CIN)
    feat = jnp.maximum(jnp.einsum("nsc,cd->nsd", x_nsc, w_backbone), 0.0)
    ref = jnp.einsum("nsd,de->nse", feat, w_beta).mean(axis=1)
    ref = ref / jnp.maximum(jnp.linalg.norm(ref, axis=1, keepdims=True), 1e-12)

    norms = jnp.sqrt(jnp.sum(out * out, axis=1))
    assert out.shape == (N, C)
    assert bool(jnp.all(jnp.abs(norms - 1.0) < 1e-3))
    assert bool(jnp.all(jnp.abs(out - ref) < 3e-2)), "mismatch vs pure-JAX reference"
    print("KERNEL_OK")
</pallas_src>

<mosaic_0001>
module attributes {stable_mosaic.version = 11 : i64} {
  func.func @_finetune_kernel(%arg0: i32, %arg1: i32, %arg2: memref<2x128x4xbf16, #tpu.memory_space<vmem>>, %arg3: memref<4x128xbf16, #tpu.memory_space<vmem>>, %arg4: memref<128x128xf32, #tpu.memory_space<vmem>>, %arg5: memref<2x128xf32, #tpu.memory_space<vmem>>, %arg6: memref<2x128xf32, #tpu.memory_space<vmem>>) attributes {dimension_semantics = [#tpu.dimension_semantics<parallel>, #tpu.dimension_semantics<arbitrary>], iteration_bounds = array<i64: 1, 2>, scalar_prefetch = 0 : i64, scratch_operands = 1 : i64, tpu.core_type = #tpu.core_type<tc>, window_params = [{transform_indices = @transform_0, window_bounds = array<i64: 2, 128, 4>}, {pipeline_mode = #tpu.pipeline_mode<synchronous>, transform_indices = @transform_1, window_bounds = array<i64: 4, 128>}, {pipeline_mode = #tpu.pipeline_mode<synchronous>, transform_indices = @transform_2, window_bounds = array<i64: 128, 128>}, {transform_indices = @transform_3, window_bounds = array<i64: 2, 128>}]} {
    %c0_i32 = arith.constant 0 : i32
    %0 = arith.cmpi eq, %arg1, %c0_i32 : i32
    %1 = arith.extui %0 : i1 to i32
    %c0_i32_0 = arith.constant 0 : i32
    %2 = arith.cmpi ne, %1, %c0_i32_0 : i32
    scf.if %2 {
      %cst_12 = arith.constant 0.000000e+00 : f32
      %17 = vector.broadcast %cst_12 : f32 to vector<2x128xf32>
      %c0_13 = arith.constant 0 : index
      %c0_14 = arith.constant 0 : index
      %18 = vector.load %arg6[%c0_13, %c0_14] : memref<2x128xf32, #tpu.memory_space<vmem>>, vector<2x128xf32>
      tpu.vector_store %arg6[%c0_13, %c0_14], %17 {strides = array<i32>} : memref<2x128xf32, #tpu.memory_space<vmem>>, vector<2x128xf32>,
    } else {
    }
    %c0 = arith.constant 0 : index
    %c0_1 = arith.constant 0 : index
    %c0_2 = arith.constant 0 : index
    %3 = vector.load %arg2[%c0, %c0_1, %c0_2] : memref<2x128x4xbf16, #tpu.memory_space<vmem>>, vector<2x128x4xbf16>
    %4 = vector.shape_cast %3 : vector<2x128x4xbf16> to vector<256x4xbf16>
    %c0_3 = arith.constant 0 : index
    %c0_4 = arith.constant 0 : index
    %5 = vector.load %arg3[%c0_3, %c0_4] : memref<4x128xbf16, #tpu.memory_space<vmem>>, vector<4x128xbf16>
    %cst = arith.constant dense<0.000000e+00> : vector<256x128xf32>
    %6 = tpu.matmul %4, %5, %cst {dimension_numbers = #tpu.dot_dimension_numbers<[1], [0], [0], [1], [0, 0, 1, 1], [], []>} : vector<256x4xbf16>, vector<4x128xbf16>, vector<256x128xf32> -> vector<256x128xf32>
    %cst_5 = arith.constant 0.000000e+00 : f32
    %7 = vector.broadcast %cst_5 : f32 to vector<256x128xf32>
    %8 = arith.maximumf %6, %7 : vector<256x128xf32>
    %c0_6 = arith.constant 0 : index
    %c0_7 = arith.constant 0 : index
    %9 = vector.load %arg6[%c0_6, %c0_7] : memref<2x128xf32, #tpu.memory_space<vmem>>, vector<2x128xf32>
    %10 = vector.shape_cast %8 : vector<256x128xf32> to vector<2x128x128xf32>
    %cst_8 = arith.constant dense<0.000000e+00> : vector<2x128xf32>
    %11 = vector.multi_reduction <add>, %10, %cst_8 [1] : vector<2x128x128xf32> to vector<2x128xf32>
    %12 = arith.addf %9, %11 : vector<2x128xf32>
    %c0_9 = arith.constant 0 : index
    %c0_10 = arith.constant 0 : index
    %13 = vector.load %arg6[%c0_9, %c0_10] : memref<2x128xf32, #tpu.memory_space<vmem>>, vector<2x128xf32>
    tpu.vector_store %arg6[%c0_9, %c0_10], %12 {strides = array<i32>} : memref<2x128xf32, #tpu.memory_space<vmem>>, vector<2x128xf32>,
    %c1_i32 = arith.constant 1 : i32
    %14 = arith.cmpi eq, %arg1, %c1_i32 : i32
    %15 = arith.extui %14 : i1 to i32
    %c0_i32_11 = arith.constant 0 : i32
    %16 = arith.cmpi ne, %15, %c0_i32_11 : i32
    scf.if %16 {
      %c0_12 = arith.constant 0 : index
      %c0_13 = arith.constant 0 : index
      %17 = vector.load %arg6[%c0_12, %c0_13] : memref<2x128xf32, #tpu.memory_space<vmem>>, vector<2x128xf32>
      %cst_14 = arith.constant 3.906250e-03 : f32
      %18 = vector.broadcast %cst_14 : f32 to vector<2x128xf32>
      %19 = arith.mulf %17, %18 : vector<2x128xf32>
      %c0_15 = arith.constant 0 : index
      %c0_16 = arith.constant 0 : index
      %20 = vector.load %arg4[%c0_15, %c0_16] : memref<128x128xf32, #tpu.memory_space<vmem>>, vector<128x128xf32>
      %cst_17 = arith.constant dense<0.000000e+00> : vector<2x128xf32>
      %21 = tpu.matmul %19, %20, %cst_17 {dimension_numbers = #tpu.dot_dimension_numbers<[1], [0], [0], [1], [0, 0, 1, 1], [], []>} : vector<2x128xf32>, vector<128x128xf32>, vector<2x128xf32> -> vector<2x128xf32>
      %22 = arith.mulf %21, %21 : vector<2x128xf32>
      %cst_18 = arith.constant dense<0.000000e+00> : vector<2xf32>
      %23 = vector.multi_reduction <add>, %22, %cst_18 [1] : vector<2x128xf32> to vector<2xf32>
      %24 = vector.shape_cast %23 : vector<2xf32> to vector<2x1xf32>
      %cst_19 = arith.constant 1.000000e-24 : f32
      %25 = vector.broadcast %cst_19 : f32 to vector<2x1xf32>
      %26 = arith.maximumf %24, %25 : vector<2x1xf32>
      %27 = math.rsqrt %26 : vector<2x1xf32>
      %28 = vector.broadcast %27 : vector<2x1xf32> to vector<2x128xf32>
      %29 = arith.mulf %21, %28 : vector<2x128xf32>
      %c0_20 = arith.constant 0 : index
      %c0_21 = arith.constant 0 : index
      %30 = vector.load %arg5[%c0_20, %c0_21] : memref<2x128xf32, #tpu.memory_space<vmem>>, vector<2x128xf32>
      tpu.vector_store %arg5[%c0_20, %c0_21], %29 {strides = array<i32>} : memref<2x128xf32, #tpu.memory_space<vmem>>, vector<2x128xf32>,
    } else {
    }
    return
  }
  func.func @transform_0(%arg0: i32, %arg1: i32) -> (i32, i32, i32) {
    %c0_i32 = arith.constant 0 : i32
    %c0_i32_0 = arith.constant 0 : i32
    return %arg0, %arg1, %c0_i32 : i32, i32, i32
  }
  func.func @transform_1(%arg0: i32, %arg1: i32) -> (i32, i32) {
    %c0_i32 = arith.constant 0 : i32
    %c0_i32_0 = arith.constant 0 : i32
    %c0_i32_1 = arith.constant 0 : i32
    return %c0_i32, %c0_i32_0 : i32, i32
  }
  func.func @transform_2(%arg0: i32, %arg1: i32) -> (i32, i32) {
    %c0_i32 = arith.constant 0 : i32
    %c0_i32_0 = arith.constant 0 : i32
    %c0_i32_1 = arith.constant 0 : i32
    return %c0_i32, %c0_i32_0 : i32, i32
  }
  func.func @transform_3(%arg0: i32, %arg1: i32) -> (i32, i32) {
    %c0_i32 = arith.constant 0 : i32
    %c0_i32_0 = arith.constant 0 : i32
    return %arg0, %c0_i32 : i32, i32
  }
}

</mosaic_0001>

<bundles_post_ra>
// kernel: tpu_custom_call.1
= control target key start
LH: loop header
LB: loop body
LE: loop exit
PB: predicated region body
PF: predicated region fallthrough
CT: control target
= control target key end

     0   :  { %8 = vsyncpa [#allocation5], 0  ;;  %s1272_s12 = smov 0   ;;  %s1274_s13 = smov 0   ;;  %s1471_s0 = inlined_call_operand.vmem [shape: bf16[2,256,4], index: 0, kind: input, shape index: {}]   ;;  %s1472_s1 = inlined_call_operand.vmem [shape: bf16[4,128], index: 1, kind: input, shape index: {}]   ;;  %s1473_s2 = inlined_call_operand.vmem [shape: f32[128,128], index: 2, kind: input, shape index: {}]   ;;  %s1474_s3 = inlined_call_operand.hbm [shape: f32[2,128], index: 3, kind: output, shape index: {}]  }
   0x1   :  { %s1276_s14 = smov 0   ;;  %s1278_s15 = smov 0  }
   0x2   :  { %s1280_s16 = smov 0  }
   0x3 LB: > { %s930_s17 = sadd.s32 4294967295, %s1245_s16   ;;  %s23_s18 = sadd.s32 1, %s1241_s15  ;;  %s1245_s16 = sphi %s1280_s16, %s14_s16   ;;  %s1241_s15 = sphi %s1278_s15, %s1479_s15   ;;  %s1237_s14 = sphi %s1276_s14, %s1478_s14   ;;  %s1233_s13 = sphi %s1274_s13, %s1477_s13   ;;  %s1229_s12 = sphi %s1272_s12, %s1476_s12  }
   0x4   : > { %p24_p0 = scmp.ge.s32.totalorder %s23_s18, 2  ;;  %p42_p1 = scmp.ne.s32.totalorder %s1233_s13, %s1229_s12 }
   0x5   : > { %p43_p2 = scmp.eq.s32.totalorder %s1245_s16, 0  ;;  %s35_s20 = sadd.s32 1, %s1233_s13 }
   0x6   : > { %s1481_s18 = smov (%p24_p0, %s23_s18), 0  ;;  %p932_p5 = scmp.ge.s32.totalorder %s1245_s16, 2 }
   0x7   : > { %p44_p3 = por %p43_p2, %p42_p1  ;;  %s31_s19 = ssub.s32 %s1241_s15, %s1481_s18 }
   0x8   : > { %p33_p4 = scmp.eq.s32.totalorder %s31_s19, 0  ;;  %142 = sbr.rel (%p932_p5) target bundleno = 27 (0x1b), region = 24 }
   0xa   : > { %s1308_s21 = scalar_select %p33_p4, %s1233_s13, %s35_s20  }
   0xf   : > { %145 = sbr.rel (!%p44_p3) target bundleno = 27 (0x1b), region = 28  ;;  %s147_s22 = sand.u32 (%p44_p3), 1, %s1233_s13  }
  0x10   : > { %s976_s23 = sshll.u32 (%p44_p3), %s1241_s15, 6  ;;  %s933_s24 = sshll.u32 (%p44_p3), %s147_s22, 7 }
  0x11   : > { %s1316_s27 = scalar_lea.vmem (%p44_p3), %s1471_s0, %s976_s23  ;;  %s149_s28 = scalar_lea.vmem (%p44_p3), [#allocation3], %s933_s24 }
  0x12   : > { %v171_v0 = vld [vmem:[%s1316_s27] sm:$0xff] (%p44_p3)   ;;  %v175_v1 = vld [vmem:[%s1316_s27 + $0x8] sm:$0xff] (%p44_p3)   ;;  %v179_v2 = vld [vmem:[%s1316_s27 + $0x10] sm:$0xff] (%p44_p3)  }
  0x13   : > { %172 = vst [vmem:[%s149_s28] sm:$0xff] (%p44_p3), %v171_v0   ;;  %176 = vst [vmem:[%s149_s28 + $0x8] sm:$0xff] (%p44_p3), %v175_v1   ;;  %v183_v3 = vld [vmem:[%s1316_s27 + $0x18] sm:$0xff] (%p44_p3)   ;;  %v187_v4 = vld [vmem:[%s1316_s27 + $0x20] sm:$0xff] (%p44_p3)  }
  0x14   : > { %180 = vst [vmem:[%s149_s28 + $0x10] sm:$0xff] (%p44_p3), %v179_v2   ;;  %v191_v5 = vld [vmem:[%s1316_s27 + $0x28] sm:$0xff] (%p44_p3)   ;;  %184 = vst [vmem:[%s149_s28 + $0x18] sm:$0xff] (%p44_p3), %v183_v3   ;;  %v195_v6 = vld [vmem:[%s1316_s27 + $0x30] sm:$0xff] (%p44_p3)  }
  0x15   : > { %188 = vst [vmem:[%s149_s28 + $0x20] sm:$0xff] (%p44_p3), %v187_v4   ;;  %192 = vst [vmem:[%s149_s28 + $0x28] sm:$0xff] (%p44_p3), %v191_v5   ;;  %v199_v7 = vld [vmem:[%s1316_s27 + $0x38] sm:$0xff] (%p44_p3)   ;;  %v203_v8 = vld [vmem:[%s1316_s27 + $0x80] sm:$0xff] (%p44_p3)  }
  0x16   : > { %196 = vst [vmem:[%s149_s28 + $0x30] sm:$0xff] %v195_v6   ;;  %200 = vst [vmem:[%s149_s28 + $0x38] sm:$0xff] %v199_v7   ;;  %v207_v9 = vld [vmem:[%s1316_s27 + $0x88] sm:$0xff]   ;;  %v211_v10 = vld [vmem:[%s1316_s27 + $0x90] sm:$0xff]  }
  0x17   : > { %204 = vst [vmem:[%s149_s28 + $0x40] sm:$0xff] %v203_v8   ;;  %v215_v11 = vld [vmem:[%s1316_s27 + $0x98] sm:$0xff]   ;;  %208 = vst [vmem:[%s149_s28 + $0x48] sm:$0xff] %v207_v9   ;;  %v219_v12 = vld [vmem:[%s1316_s27 + $0xa0] sm:$0xff]  }
  0x18   : > { %212 = vst [vmem:[%s149_s28 + $0x50] sm:$0xff] %v211_v10   ;;  %216 = vst [vmem:[%s149_s28 + $0x58] sm:$0xff] %v215_v11   ;;  %v223_v13 = vld [vmem:[%s1316_s27 + $0xa8] sm:$0xff]   ;;  %v227_v14 = vld [vmem:[%s1316_s27 + $0xb0] sm:$0xff]  }
  0x19   : > { %220 = vst [vmem:[%s149_s28 + $0x60] sm:$0xff] %v219_v12   ;;  %224 = vst [vmem:[%s149_s28 + $0x68] sm:$0xff] %v223_v13   ;;  %v231_v15 = vld [vmem:[%s1316_s27 + $0xb8] sm:$0xff]  }
  0x1a   : > { %228 = vst [vmem:[%s149_s28 + $0x70] sm:$0xff] %v227_v14   ;;  %232 = vst [vmem:[%s149_s28 + $0x78] sm:$0xff] %v231_v15  }
  0x1b PF: > { %p936_p6 = scmp.ge.s32.totalorder %s1245_s16, 1  ;;  %p320_p7 = scmp.lt.s32.totalorder %s1245_s16, 3 }
  0x1d   : > { %p321_p8 = pnand %p936_p6, %p320_p7 }
  0x1e   : > { %s327_s29 = sand.u32 (!%p321_p8), 1, %s1229_s12   ;;  %p938_p9 = scmp.ne.s32.totalorder (!%p321_p8), %s1237_s14, 0 }
  0x1f   : > { %324 = sbr.rel (%p321_p8) target bundleno = 720 (0x2d0), region = 69  ;;  %s937_s30 = sshll.u32 (!%p321_p8), %s327_s29, 7 }
  0x20   : > { %s1337_s4 = scalar_lea.vmem (!%p321_p8), [#allocation3], %s937_s30 }
  0x26   : > { %351 = sbr.rel (%p938_p9) target bundleno = 45 (0x2d), region = 77  ;;  %v1247_v16 = vmov (!%p938_p9), 0.0  }
  0x27   : > { %352 = vst [vmem:[#allocation2] sm:$0x3] (!%p938_p9), %v1247_v16 }
  0x2d PF: > { %v385_v17 = vld [vmem:[%s1472_s1] sm:$0x3]  ;;  %vm515_vm0 = vcmask 1041408   ;;  %v1159_v18 = vld [vmem:[%s1337_s4] sm:$0xff]   ;;  %vm466_vm1 = vcmask 31744   ;;  %v1161_v21 = vld [vmem:[%s1337_s4 + $0x8] sm:$0xff]  }
  0x2e   : > { %1106 = vmatprep.subr.msk.bf16.mxu0 %vm515_vm0, %v385_v17  ;;  %1107 = vmatprep.subr.msk.bf16.mxu1 %vm515_vm0, %v385_v17  ;;  %v517_v19 = vsel %vm515_vm0, %v385_v17, 0  ;;  %v1160_v20 = vld [vmem:[%s1337_s4 + $0x40] sm:$0xff]   ;;  %v1162_v22 = vld [vmem:[%s1337_s4 + $0x48] sm:$0xff]   ;;  %v1163_v23 = vld [vmem:[%s1337_s4 + $0x10] sm:$0xff]   ;;  %vm757_vm2 = vcmask 1041409   ;;  %p971_p10 = scmp.ne.s32.totalorder %s1237_s14, 1 }
  0x2f   : > { %1012 = vmatpush3.bf16.msra.mxu0 %v517_v19  ;;  %1105 = vmatpush3.bf16.msra.mxu1 %v517_v19  ;;  %v1164_v24 = vld [vmem:[%s1337_s4 + $0x50] sm:$0xff]   ;;  %v1165_v25 = vld [vmem:[%s1337_s4 + $0x18] sm:$0xff]   ;;  %v1167_v27 = vld [vmem:[%s1337_s4 + $0x20] sm:$0xff]   ;;  %vm1249_vm3 = vmmov (!%p971_p10), 0  }
  0x30   : > { %1013 = vmatprep.mubr.msk.bf16.mxu0 %vm466_vm1, %v1159_v18  ;;  %1029 = vmatprep.mubr.msk.bf16.mxu1 %vm466_vm1, %v1160_v20  ;;  %v1166_v26 = vld [vmem:[%s1337_s4 + $0x58] sm:$0xff]   ;;  %v1168_v28 = vld [vmem:[%s1337_s4 + $0x60] sm:$0xff]   ;;  %v1169_v29 = vld [vmem:[%s1337_s4 + $0x28] sm:$0xff]  }
  0x31   : > { %v1170_v30 = vld [vmem:[%s1337_s4 + $0x68] sm:$0xff]   ;;  %v1171_v31 = vld [vmem:[%s1337_s4 + $0x30] sm:$0xff]   ;;  %v1173_v33 = vld [vmem:[%s1337_s4 + $0x38] sm:$0xff]  }
  0x32   : > { %1014 = vmatmul.mubr.msk.bf16.vlgmr.msra.gmra.mrb[0].mxu0 %vm466_vm1, %v1161_v21  ;;  %1030 = vmatmul.mubr.msk.bf16.vlgmr.msra.gmra.mrb[0].mxu1 %vm466_vm1, %v1162_v22  ;;  %v1172_v32 = vld [vmem:[%s1337_s4 + $0x70] sm:$0xff]   ;;  %v1174_v34 = vld [vmem:[%s1337_s4 + $0x78] sm:$0xff]  }
  0x33   : > { %1017 = vmatprep.mubr.msk.bf16.mxu0 %vm466_vm1, %v1163_v23  ;;  %1033 = vmatprep.mubr.msk.bf16.mxu1 %vm466_vm1, %v1164_v24 }
  0x3a   : > { %1018 = vmatmul.mubr.msk.bf16.gmra.mrb[4].mxu0 %vm466_vm1, %v1165_v25  ;;  %1034 = vmatmul.mubr.msk.bf16.gmra.mrb[4].mxu1 %vm466_vm1, %v1166_v26 }
  0x3b   : > { %1021 = vmatprep.mubr.msk.bf16.mxu0 %vm466_vm1, %v1167_v27  ;;  %1037 = vmatprep.mubr.msk.bf16.mxu1 %vm466_vm1, %v1168_v28 }
  0x42   : > { %1022 = vmatmul.mubr.msk.bf16.gmra.mrb[8].mxu0 %vm466_vm1, %v1169_v29  ;;  %1038 = vmatmul.mubr.msk.bf16.gmra.mrb[8].mxu1 %vm466_vm1, %v1170_v30 }
  0x43   : > { %1025 = vmatprep.mubr.msk.bf16.mxu0 %vm466_vm1, %v1171_v31  ;;  %1041 = vmatprep.mubr.msk.bf16.mxu1 %vm466_vm1, %v1172_v32 }
  0x4a   : > { %1026 = vmatmul.mubr.msk.bf16.gmra.mrb[12].mxu0 %vm466_vm1, %v1173_v33  ;;  %1042 = vmatmul.mubr.msk.bf16.gmra.mrb[12].mxu1 %vm466_vm1, %v1174_v34 }
 0x105   : > { %v1015_v35 = vpop.f32.mrb[0].mxu0  ;;  %v1031_v36 = vpop.f32.mrb[0].mxu1 }
 0x106   : > { %v553_v37 = vpop.f32.mrb[1].mxu0  ;;  %v617_v38 = vpop.f32.mrb[1].mxu1  ;;  %v682_v47 = vmax.f32 %v1015_v35, 0.0  ;;  %v698_v49 = vmax.f32 %v1031_v36, 0.0 }
 0x107   : > { %v1016_v39 = vpop.f32.mrb[2].mxu0  ;;  %v1032_v40 = vpop.f32.mrb[2].mxu1  ;;  %v680_v42 = vmax.f32 %v553_v37, 0.0  ;;  %v696_v45 = vmax.f32 %v617_v38, 0.0 }
 0x108   : > { %v556_v41 = vpop.f32.mrb[3].mxu0  ;;  %v620_v44 = vpop.f32.mrb[3].mxu1  ;;  %v683_v51 = vmax.f32 %v1016_v39, 0.0  ;;  %v699_v54 = vmax.f32 %v1032_v40, 0.0 }
 0x109   : > { %v681_v43 = vmax.f32 %v556_v41, 0.0  ;;  %v697_v46 = vmax.f32 %v620_v44, 0.0 }
 0x10b   : > { %v713_v48 = vadd.f32 %v681_v43, %v680_v42  ;;  %v734_v50 = vadd.f32 %v697_v46, %v696_v45 }
 0x10d   : > { %v714_v52 = vadd.f32 %v713_v48, %v682_v47  ;;  %v1019_v53 = vpop.f32.mrb[4].mxu0  ;;  %v735_v55 = vadd.f32 %v734_v50, %v698_v49  ;;  %v1035_v56 = vpop.f32.mrb[4].mxu1 }
 0x10e   : > { %v569_v57 = vpop.f32.mrb[5].mxu0  ;;  %v633_v60 = vpop.f32.mrb[5].mxu1  ;;  %v686_v7 = vmax.f32 %v1019_v53, 0.0  ;;  %v702_v9 = vmax.f32 %v1035_v56, 0.0 }
 0x10f   : > { %v684_v58 = vmax.f32 %v569_v57, 0.0  ;;  %v715_v59 = vadd.f32 %v714_v52, %v683_v51  ;;  %v1020_v61 = vpop.f32.mrb[6].mxu0  ;;  %v700_v62 = vmax.f32 %v633_v60, 0.0  ;;  %v736_v63 = vadd.f32 %v735_v55, %v699_v54  ;;  %v1036_v0 = vpop.f32.mrb[6].mxu1 }
 0x110   : > { %v572_v1 = vpop.f32.mrb[7].mxu0  ;;  %v636_v4 = vpop.f32.mrb[7].mxu1  ;;  %v687_v11 = vmax.f32 %v1020_v61, 0.0  ;;  %v703_v14 = vmax.f32 %v1036_v0, 0.0 }
 0x111   : > { %v716_v2 = vadd.f32 %v715_v59, %v684_v58  ;;  %v685_v3 = vmax.f32 %v572_v1, 0.0  ;;  %v737_v5 = vadd.f32 %v736_v63, %v700_v62  ;;  %v701_v6 = vmax.f32 %v636_v4, 0.0 }
 0x113   : > { %v717_v8 = vadd.f32 %v716_v2, %v685_v3  ;;  %v738_v10 = vadd.f32 %v737_v5, %v701_v6 }
 0x115   : > { %v718_v12 = vadd.f32 %v717_v8, %v686_v7  ;;  %v1023_v13 = vpop.f32.mrb[8].mxu0  ;;  %v739_v15 = vadd.f32 %v738_v10, %v702_v9  ;;  %v1039_v16 = vpop.f32.mrb[8].mxu1 }
 0x116   : > { %v585_v17 = vpop.f32.mrb[9].mxu0  ;;  %v649_v20 = vpop.f32.mrb[9].mxu1  ;;  %v690_v31 = vmax.f32 %v1023_v13, 0.0  ;;  %v706_v33 = vmax.f32 %v1039_v16, 0.0  ;;  %v768_v16 = vld [vmem:[%s1473_s2] sm:$0xff] (!%p971_p10) }
 0x117   : > { %v688_v18 = vmax.f32 %v585_v17, 0.0  ;;  %v719_v19 = vadd.f32 %v718_v12, %v687_v11  ;;  %v1024_v21 = vpop.f32.mrb[10].mxu0  ;;  %v704_v22 = vmax.f32 %v649_v20, 0.0  ;;  %v740_v23 = vadd.f32 %v739_v15, %v703_v14  ;;  %v1040_v24 = vpop.f32.mrb[10].mxu1  ;;  %v712_v12 = vld [vmem:[#allocation2] sm:$0x3] }
 0x118   : > { %v588_v25 = vpop.f32.mrb[11].mxu0  ;;  %v652_v28 = vpop.f32.mrb[11].mxu1  ;;  %v691_v35 = vmax.f32 %v1024_v21, 0.0  ;;  %v707_v38 = vmax.f32 %v1040_v24, 0.0  ;;  %v769_v17 = vld [vmem:[%s1473_s2 + $0x8] sm:$0xff] (!%p971_p10)  ;;  %v771_v21 = vld [vmem:[%s1473_s2 + $0x18] sm:$0xff] (!%p971_p10) }
 0x119   : > { %v720_v26 = vadd.f32 %v719_v19, %v688_v18  ;;  %v689_v27 = vmax.f32 %v588_v25, 0.0  ;;  %v741_v29 = vadd.f32 %v740_v23, %v704_v22  ;;  %v705_v30 = vmax.f32 %v652_v28, 0.0  ;;  %v770_v18 = vld [vmem:[%s1473_s2 + $0x10] sm:$0xff] (!%p971_p10)  ;;  %v772_v24 = vld [vmem:[%s1473_s2 + $0x20] sm:$0xff] (!%p971_p10)  ;;  %v773_v25 = vld [vmem:[%s1473_s2 + $0x28] sm:$0xff] (!%p971_p10) }
 0x11a   : > { %v1248_v19 = vmov (!%p971_p10), 0.0|0.0   ;;  %v1081_v20 = vpack.c.bf16 (!%p971_p10), %v769_v17, %v768_v16  ;;  %v1250_v22 = vmov (!%p971_p10), 0.0   ;;  %v1084_v23 = vpack.c.bf16 (!%p971_p10), %v771_v21, %v770_v18  ;;  %v775_v28 = vld [vmem:[%s1473_s2 + $0x38] sm:$0xff] (!%p971_p10) }
 0x11b   : > { %v721_v32 = vadd.f32 %v720_v26, %v689_v27  ;;  %v742_v34 = vadd.f32 %v741_v29, %v705_v30  ;;  %1080 = vmatprep.subr.bf16.mxu0 (!%p971_p10), %v1248_v19  ;;  %1077 = vmatprep.mubr.msk.f32.mxu0 (!%p971_p10), %vm1249_vm3, %v1250_v22  ;;  %v1087_v26 = vpack.c.bf16 (!%p971_p10), %v773_v25, %v772_v24  ;;  %v774_v27 = vld [vmem:[%s1473_s2 + $0x30] sm:$0xff] (!%p971_p10)  ;;  %v776_v30 = vld [vmem:[%s1473_s2 + $0x40] sm:$0xff] (!%p971_p10) }
 0x11c   : > { %1082 = vmatpush3.bf16.msra.mxu0 (!%p971_p10), %v1081_v20  ;;  %v1090_v29 = vpack.c.bf16 (!%p971_p10), %v775_v28, %v774_v27 }
 0x11d   : > { %v722_v36 = vadd.f32 %v721_v32, %v690_v31  ;;  %v1027_v37 = vpop.f32.mrb[12].mxu0  ;;  %v743_v39 = vadd.f32 %v742_v34, %v706_v33  ;;  %v1043_v40 = vpop.f32.mrb[12].mxu1  ;;  %1083 = vmatprep.subr.bf16.mxu0 (!%p971_p10), %v1248_v19  ;;  %v777_v31 = vld [vmem:[%s1473_s2 + $0x48] sm:$0xff] (!%p971_p10)  ;;  %v778_v33 = vld [vmem:[%s1473_s2 + $0x50] sm:$0xff] (!%p971_p10)  ;;  %v779_v34 = vld [vmem:[%s1473_s2 + $0x58] sm:$0xff] (!%p971_p10) }
 0x11e   : > { %v601_v41 = vpop.f32.mrb[13].mxu0  ;;  %v665_v44 = vpop.f32.mrb[13].mxu1  ;;  %v694_v55 = vmax.f32 %v1027_v37, 0.0  ;;  %v710_v57 = vmax.f32 %v1043_v40, 0.0  ;;  %v1093_v32 = vpack.c.bf16 (!%p971_p10), %v777_v31, %v776_v30  ;;  %v781_v37 = vld [vmem:[%s1473_s2 + $0x68] sm:$0xff] (!%p971_p10)  ;;  %v783_v40 = vld [vmem:[%s1473_s2 + $0x78] sm:$0xff] (!%p971_p10) }
 0x11f   : > { %v692_v42 = vmax.f32 %v601_v41, 0.0  ;;  %v723_v43 = vadd.f32 %v722_v36, %v691_v35  ;;  %v1028_v45 = vpop.f32.mrb[14].mxu0  ;;  %v708_v46 = vmax.f32 %v665_v44, 0.0  ;;  %v744_v47 = vadd.f32 %v743_v39, %v707_v38  ;;  %v1044_v48 = vpop.f32.mrb[14].mxu1  ;;  %v780_v36 = vld [vmem:[%s1473_s2 + $0x60] sm:$0xff] (!%p971_p10)  ;;  %v782_v39 = vld [vmem:[%s1473_s2 + $0x70] sm:$0xff] (!%p971_p10) }
 0x120   : > { %v604_v49 = vpop.f32.mrb[15].mxu0  ;;  %v668_v52 = vpop.f32.mrb[15].mxu1  ;;  %v695_v59 = vmax.f32 %v1028_v45, 0.0  ;;  %v711_v61 = vmax.f32 %v1044_v48, 0.0  ;;  %1085 = vmatpush3.bf16.msra.mxu0 (!%p971_p10), %v1084_v23  ;;  %v1096_v35 = vpack.c.bf16 (!%p971_p10), %v779_v34, %v778_v33  ;;  %v1099_v38 = vpack.c.bf16 (!%p971_p10), %v781_v37, %v780_v36 }
 0x121   : > { %v724_v50 = vadd.f32 %v723_v43, %v692_v42  ;;  %v693_v51 = vmax.f32 %v604_v49, 0.0  ;;  %v745_v53 = vadd.f32 %v744_v47, %v708_v46  ;;  %v709_v54 = vmax.f32 %v668_v52, 0.0  ;;  %1086 = vmatprep.subr.bf16.mxu0 (!%p971_p10), %v1248_v19 }
 0x122   : > { %v1102_v41 = vpack.c.bf16 (!%p971_p10), %v783_v40, %v782_v39 }
 0x123   : > { %v725_v56 = vadd.f32 %v724_v50, %v693_v51  ;;  %v746_v58 = vadd.f32 %v745_v53, %v709_v54 }
 0x124   : > { %1088 = vmatpush3.bf16.msra.mxu0 (!%p971_p10), %v1087_v26 }
 0x125   : > { %v726_v60 = vadd.f32 %v725_v56, %v694_v55  ;;  %v747_v62 = vadd.f32 %v746_v58, %v710_v57  ;;  %1089 = vmatprep.subr.bf16.mxu0 (!%p971_p10), %v1248_v19 }
 0x127   : > { %v727_v63 = vadd.f32 %v726_v60, %v695_v59  ;;  %v748_v0 = vadd.f32 %v747_v62, %v711_v61 }
 0x128   : > { %1091 = vmatpush3.bf16.msra.mxu0 (!%p971_p10), %v1090_v29 }
 0x129   : > { %v728_v1 = vrot.slane %v727_v63, 4  ;;  %v749_v2 = vrot.slane %v748_v0, 4  ;;  %1092 = vmatprep.subr.bf16.mxu0 (!%p971_p10), %v1248_v19 }
 0x12b   : > { %v729_v3 = vadd.f32 %v728_v1, %v727_v63  ;;  %v750_v4 = vadd.f32 %v749_v2, %v748_v0 }
 0x12c   : > { %1094 = vmatpush3.bf16.msra.mxu0 (!%p971_p10), %v1093_v32 }
 0x12d   : > { %v730_v5 = vrot.slane %v729_v3, 2  ;;  %v751_v6 = vrot.slane %v750_v4, 2  ;;  %1095 = vmatprep.subr.bf16.mxu0 (!%p971_p10), %v1248_v19 }
 0x12f   : > { %v731_v7 = vadd.f32 %v730_v5, %v729_v3  ;;  %v752_v8 = vadd.f32 %v751_v6, %v750_v4 }
 0x130   : > { %1097 = vmatpush3.bf16.msra.mxu0 (!%p971_p10), %v1096_v35 }
 0x131   : > { %v732_v9 = vrot.slane %v731_v7, 1  ;;  %v753_v10 = vrot.slane %v752_v8, 1  ;;  %1098 = vmatprep.subr.bf16.mxu0 (!%p971_p10), %v1248_v19 }
 0x132   : > { %765 = sbr.rel (%p971_p10) target bundleno = 695 (0x2b7), region = 81 }
 0x133   : > { %v733_v11 = vadd.f32 %v732_v9, %v731_v7  ;;  %v754_v13 = vadd.f32 %v753_v10, %v752_v8 }
 0x134   : > { %1100 = vmatpush3.bf16.msra.mxu0 (!%p971_p10), %v1099_v38 }
 0x135   : > { %v758_v14 = vsel %vm757_vm2, %v754_v13, %v733_v11  ;;  %1101 = vmatprep.subr.bf16.mxu0 (!%p971_p10), %v1248_v19 }
 0x136   : > { %v760_v15 = vadd.f32 %v758_v14, %v712_v12 }
 0x138   : > { %761 = vst [vmem:[#allocation2] sm:$0x3] %v760_v15  ;;  %1103 = vmatpush3.bf16.msra.mxu0 (!%p971_p10), %v1102_v41 }
 0x13f   : > { %v766_v42 = vld [vmem:[#allocation2] sm:$0x3] }
 0x140   : > { %v767_v43 = vmul.f32 0.00390625, %v766_v42 }
 0x142   : > { %1078 = vmatmul.mubr.f32.vlgmr.msra.gmra.mrb[0].mxu0 %v767_v43 }
 0x215   : > { %v850_v44 = vpop.f32.mrb[0].mxu0 }
 0x216   : > { %v1079_v45 = vpop.f32.mrb[1].mxu0  ;;  %v854_v46 = vmul.f32 %v850_v44, %v850_v44 }
 0x218   : > { %v855_v47 = vsel %vm515_vm0, %v854_v46, 0.0 }
 0x219   : > { %856 = vadd.xlane.f32.xlu0 %v855_v47 }
 0x2a6   : > { %v857_v48 = vpop.xlane.xlu0 %856 }
 0x2a7   : > { %v858_v49 = vmax.f32 %v857_v48, 1e-24 }
 0x2a9   : > { %1175 = vrsqrt.f32 %v858_v49 }
 0x2b3   : > { %v1176_v50 = vpop.eup %1175 }
 0x2b4   : > { %v860_v51 = vmul.f32 %v1176_v50, %v850_v44 }
 0x2b6   : > { %861 = vst [vmem:[#allocation4] sm:$0x3] %v860_v51 }
 0x2b7 PF: > { %p1430_p11 = scmp.eq.s32.totalorder %s930_s17, 1  ;;  %s1251_s25 = smov [#allocation4]  }
 0x2b8   : > { %s871_s26 = sshll.u32 %s1251_s25, 4  ;;  %s872_s26 = int_to_ptr.vmem [resolvable:$true] %s871_s26 }
 0x2b9   : > { %s1177_s27 = scalar_lea.vmem %s872_s26, 32  ;;  %p1184_p1 = scmp.lt.s32.totalorder %s872_s26, %s872_s26 }
 0x2ba   : > { %p1178_p12 = scmp.ne.s32.totalorder %s872_s26, %s1177_s27  ;;  %p1185_p2 = scmp.lt.s32.totalorder %s1177_s27, %s1177_s27 }
 0x2bc   : > { %p1179_p13 = pnand %p1178_p12, %p1430_p11  ;;  %p1186_p3 = por %p1185_p2, %p1184_p1 }
 0x2be   : > { %p1180_p0 = pneg %p1179_p13 }
 0x2c0   : > { %p1187_p4 = pnand %p1186_p3, %p1180_p0 }
 0x2c2   : > { %1190 = shalt.err (!%p1187_p4)
}
 0x2c3   : > { %s1191_s17 = scalar_lea.hbm %s1474_s3, 32 }
 0x2c4   : > { %p1192_p5 = scmp.ne.s32.totalorder %s1474_s3, %s1191_s17  ;;  %p1197_p8 = scmp.lt.u32.totalorder %s1191_s17, %s1474_s3 }
 0x2c6   : > { %p1193_p6 = pnand %p1192_p5, %p1430_p11 }
 0x2c8   : > { %p1194_p7 = pneg %p1193_p6 }
 0x2ca   : > { %p1199_p9 = pnand %p1197_p8, %p1194_p7 }
 0x2cc   : > { %1202 = shalt.err (!%p1199_p9)
}
 0x2cd   : > { %1109 = dma.vmem_to_hbm [thread:$0]  (%p1430_p11), %s872_s26, 32, %s1474_s3, [#allocation5]  }
 0x2ce   : > { %1224 = dma.done.wait (%p1430_p11), [#allocation5], 32  }
 0x2cf   : > { %1226 = vsyncadd (%p1430_p11), [#allocation5], 4294967264 }
 0x2d0 PF: > { %s14_s16 = sadd.s32 1, %s1245_s16   ;;  %s1476_s12 = smov %s1233_s13 }
 0x2d1   : > { %p11_p10 = scmp.ge.s32.totalorder %s14_s16, 4   ;;  %s1477_s13 = smov %s1308_s21 }
 0x2d2   : > { %s1478_s14 = smov %s1241_s15  ;;  %s1479_s15 = smov %s1481_s18 }
 0x2d3   :  { %13 = sbr.rel (!%p11_p10) target bundleno = 3 (0x3), region = 114 }
 0x2da   :  { %884 = vsyncpa [#allocation5], 1 }
 0x2db   :  { %886 = vsyncpa [#allocation5 + $0x1], 1 }

</bundles_post_ra>
